<compile_context>
chip_gen: v5e
topology: v5e:2x2
jax: 0.10.0
libtpu: 0.0.40
codegen_flags: <defaults>
</compile_context>

<pallas_src>
import math

import jax
import jax.numpy as jnp
from jax import lax
from jax.experimental import pallas as pl
from jax.experimental.pallas import tpu as pltpu


def _round_up(x, m):
    return (x + m - 1) // m * m


def _data_embedding_kernel(x_ref, halo_ref, w_ref, pe_ref, o_ref):
    # x_ref   : (1, TL, C)    x rows for this tile (wrap-extended), compute dtype
    # halo_ref: (1, 1, 2, C)  [x[(tile_start-1) % L], x[(tile_start+TL) % L]]
    # w_ref   : (3, C, D)     conv weight, tap-major leading dim, f32, resident
    # pe_ref  : (TL, D)       positional-embedding tile, compute dtype
    # o_ref   : (1, TL, D)
    TL = x_ref.shape[1]

    xt = x_ref[0].astype(jnp.float32)              # (TL, C), f32 for shift construction
    halo = halo_ref[0, 0].astype(jnp.float32)      # (2, C)

    row = lax.broadcasted_iota(jnp.int32, (TL, 1), 0)
    # x_prev[t] = x[t-1]; x_next[t] = x[t+1]  (circular; cross-tile rows from the halo)
    x_prev = jnp.where(row == 0, halo[0:1, :], pltpu.roll(xt, 1, axis=0))
    x_next = jnp.where(row == TL - 1, halo[1:2, :], pltpu.roll(xt, TL - 1, axis=0))

    y = jnp.dot(x_prev, w_ref[0], preferred_element_type=jnp.float32)
    y = y + jnp.dot(xt, w_ref[1], preferred_element_type=jnp.float32)
    y = y + jnp.dot(x_next, w_ref[2], preferred_element_type=jnp.float32)

    o_ref[0] = (y + pe_ref[...].astype(jnp.float32)).astype(o_ref.dtype)


def data_embedding(x, conv_weight, pe_full, *, tile_l=1024,
                   compute_dtype=jnp.float32, out_dtype=jnp.float32):
    """DataEmbedding forward.

    x:           (B, L, C)    float32, channels-last (PyTorch forward input layout)
    conv_weight: (D, C, 3)    PyTorch Conv1d weight layout (out, in, kernel)
    pe_full:     (max_len, D) precomputed positional embedding
    Returns (B, L, D) in `out_dtype`.  Dropout p=0 is the identity.

    compute_dtype controls the HBM streaming dtype of x / PE (use bf16 on v6e/v7x for a
    near-2x mem-bound win together with out_dtype=bf16); all in-kernel math stays f32.
    tile_l is auto-capped so the double-buffered streaming working set stays within a
    conservative VMEM budget (fits v5e defaults and v7x's 64 MiB physical VMEM).
    """
    B, L, C = x.shape
    D = conv_weight.shape[0]
    if conv_weight.shape != (D, C, 3):
        raise ValueError(f"conv_weight must be (d_model, c_in, 3), got {conv_weight.shape}")
    if pe_full.shape[0] < L:
        raise ValueError(f"pe_full has max_len={pe_full.shape[0]} < sequence length L={L}")

    itemsize = lambda dt: jnp.dtype(dt).itemsize

    # ---- conv weight: (D, C, 3) -> (3, C, D) tap-major; f32 (read once, resident) ----
    w = jnp.transpose(conv_weight, (2, 1, 0)).astype(jnp.float32)          # (3, C, D)

    # ---- L tiling (sublane-aligned) with a VMEM budget cap on the streamed buffers ----
    L8 = _round_up(L, 8)
    TL = _round_up(min(tile_l, L8), 8)

    def step_bytes(tl):  # double-buffered streaming buffers per grid step
        return 2 * (tl * C * itemsize(compute_dtype)       # x tile
                    + tl * D * itemsize(compute_dtype)     # pe tile
                    + tl * D * itemsize(out_dtype))        # out tile

    _STEP_VMEM_BUDGET = 24 * 1024 * 1024
    while TL > 8 and step_bytes(TL) > _STEP_VMEM_BUDGET:
        TL = max(8, _round_up(TL // 2, 8))

    Lp = _round_up(L8, TL)
    n_tiles = Lp // TL

    # ---- x source, wrap-extended to Lp rows so in-tile successors past L-1 wrap to x[0] ----
    if Lp != L:
        idx = jnp.arange(Lp, dtype=jnp.int32) % L
        x_src = jnp.take(x, idx, axis=1)
    else:
        x_src = x
    x_src = x_src.astype(compute_dtype)                                    # (B, Lp, C)

    # ---- tiny per-(batch, tile) halo rows: predecessor of first row, successor of last ----
    starts = jnp.arange(n_tiles, dtype=jnp.int32) * TL
    prev_idx = (starts - 1) % L
    next_idx = (starts + TL) % L
    halo = jnp.stack(
        [jnp.take(x, prev_idx, axis=1), jnp.take(x, next_idx, axis=1)],
        axis=2).astype(compute_dtype)                                      # (B, n_tiles, 2, C)

    # ---- positional embedding (streamed in compute dtype; re-used across batch steps) ----
    pe = pe_full[:L].astype(compute_dtype)
    if Lp != L:
        pe = jnp.pad(pe, ((0, Lp - L), (0, 0)))                            # (Lp, D)

    # ---- scheduling hints ----
    bytes_accessed = (B * Lp * C * itemsize(compute_dtype)                 # x
                      + B * n_tiles * 2 * C * itemsize(compute_dtype)      # halo
                      + 3 * C * D * 4                                      # weight (once)
                      + Lp * D * itemsize(compute_dtype)                   # pe (once per tile)
                      + B * Lp * D * itemsize(out_dtype))                  # output
    cost = pl.CostEstimate(flops=2 * B * Lp * 3 * C * D,
                           transcendentals=0,
                           bytes_accessed=int(bytes_accessed))

    vmem_need = (step_bytes(TL)
                 + 2 * 3 * C * D * 4                                       # weight double-buffer
                 + 2 * 2 * C * itemsize(compute_dtype))                    # halo double-buffer
    vmem_limit = int(min(max(32 * 1024 * 1024, vmem_need + (8 << 20)), 100 * 1024 * 1024))

    # ---- grid: L tiles outer ("parallel" for megacore), batch innermost ("arbitrary")
    #      so the PE block index (l, 0) is unchanged across consecutive steps -> no re-DMA ----
    grid = (n_tiles, B)
    out = pl.pallas_call(
        _data_embedding_kernel,
        out_shape=jax.ShapeDtypeStruct((B, Lp, D), out_dtype),
        grid_spec=pl.GridSpec(
            grid=grid,
            in_specs=[
                pl.BlockSpec((1, TL, C), lambda l, b: (b, l, 0)),          # x tile
                pl.BlockSpec((1, 1, 2, C), lambda l, b: (b, l, 0, 0)),     # halo rows
                pl.BlockSpec((3, C, D), lambda l, b: (0, 0, 0)),           # weight: resident
                pl.BlockSpec((TL, D), lambda l, b: (l, 0)),                # pe: per L tile only
            ],
            out_specs=pl.BlockSpec((1, TL, D), lambda l, b: (b, l, 0)),
        ),
        compiler_params=pltpu.CompilerParams(
            dimension_semantics=("parallel", "arbitrary"),
            vmem_limit_bytes=vmem_limit),
        cost_estimate=cost,
    )(x_src, halo, w, pe)

    if Lp != L:
        out = out[:, :L]
    return out


def make_positional_embedding(d_model, max_len=5000):
    # Note: like the PyTorch original, assumes even d_model.
    position = jnp.arange(max_len, dtype=jnp.float32)[:, None]             # (max_len, 1)
    div_term = jnp.exp(jnp.arange(0, d_model, 2, dtype=jnp.float32)
                       * -(math.log(10000.0) / d_model))                   # (d_model//2,)
    pe = jnp.zeros((max_len, d_model), jnp.float32)
    pe = pe.at[:, 0::2].set(jnp.sin(position * div_term))
    pe = pe.at[:, 1::2].set(jnp.cos(position * div_term))
    return pe


def make_conv_weight(key, c_in, d_model, kernel_size=3):
    # kaiming_normal_(fan_in, leaky_relu): std = gain / sqrt(fan_in),
    # gain = sqrt(2 / (1 + 0.01^2)), fan_in = c_in * kernel_size
    fan_in = c_in * kernel_size
    gain = math.sqrt(2.0 / (1.0 + 0.01 ** 2))
    std = gain / math.sqrt(fan_in)
    return std * jax.random.normal(key, (d_model, c_in, kernel_size), jnp.float32)


def reference_forward(x, conv_weight, pe_full):
    # plain-JAX reference: circular-pad conv1d + positional embedding (dropout p=0 is identity)
    B, L, C = x.shape
    xp = jnp.transpose(x, (0, 2, 1))                                       # (B, C, L)
    xp = jnp.pad(xp, ((0, 0), (0, 0), (1, 1)), mode="wrap")
    y = jax.lax.conv_general_dilated(
        xp, conv_weight, window_strides=(1,), padding="VALID",
        dimension_numbers=("NCH", "OIH", "NCH"))                           # (B, D, L)
    y = jnp.transpose(y, (0, 2, 1))                                        # (B, L, D)
    return y + pe_full[None, :L]


if __name__ == "__main__":
    B, L, C, D = 2, 8, 4, 32
    key = jax.random.PRNGKey(0)
    kx, kw = jax.random.split(key)

    x = jax.random.normal(kx, (B, L, C), jnp.float32)
    conv_weight = make_conv_weight(kw, C, D)
    pe_full = make_positional_embedding(D)

    ref = reference_forward(x, conv_weight, pe_full)

    # f32 path
    out = data_embedding(x, conv_weight, pe_full)
    out = jax.block_until_ready(out)
    assert out.shape == (B, L, D)
    assert jnp.allclose(out, ref, atol=1e-5, rtol=1e-5), "f32 mismatch vs reference"

    # bf16 streaming/output path (mem-bound win on v6e/v7x); note x/PE are read in bf16,
    # so tolerance vs the f32 reference is loosened accordingly.
    out_bf16 = data_embedding(x, conv_weight, pe_full,
                              compute_dtype=jnp.bfloat16, out_dtype=jnp.bfloat16)
    out_bf16 = jax.block_until_ready(out_bf16)
    assert out_bf16.shape == (B, L, D)
    assert jnp.allclose(out_bf16.astype(jnp.float32), ref, atol=1e-1, rtol=1e-1), \
        "bf16 mismatch vs reference"

    # non-aligned / non-dividing shape exercise (L not multiple of 8, D not multiple of 128)
    L2, D2 = 13, 48
    x2 = jax.random.normal(kx, (B, L2, C), jnp.float32)
    w2 = make_conv_weight(kw, C, D2)
    pe2 = make_positional_embedding(D2)
    out2 = jax.block_until_ready(data_embedding(x2, w2, pe2))
    assert jnp.allclose(out2, reference_forward(x2, w2, pe2), atol=1e-5, rtol=1e-5), \
        "non-aligned-shape mismatch vs reference"

    print("KERNEL_OK")
</pallas_src>

<mosaic_0001>
module attributes {stable_mosaic.version = 11 : i64} {
  func.func @_data_embedding_kernel(%arg0: i32, %arg1: i32, %arg2: memref<1x8x4xf32, #tpu.memory_space<vmem>>, %arg3: memref<1x1x2x4xf32, #tpu.memory_space<vmem>>, %arg4: memref<3x4x32xf32, #tpu.memory_space<vmem>>, %arg5: memref<8x32xf32, #tpu.memory_space<vmem>>, %arg6: memref<1x8x32xf32, #tpu.memory_space<vmem>>) attributes {dimension_semantics = [#tpu.dimension_semantics<parallel>, #tpu.dimension_semantics<arbitrary>], iteration_bounds = array<i64: 1, 2>, scalar_prefetch = 0 : i64, scratch_operands = 0 : i64, tpu.core_type = #tpu.core_type<tc>, window_params = [{transform_indices = @transform_0, window_bounds = array<i64: 1, 8, 4>}, {transform_indices = @transform_1, window_bounds = array<i64: 1, 1, 2, 4>}, {pipeline_mode = #tpu.pipeline_mode<synchronous>, transform_indices = @transform_2, window_bounds = array<i64: 3, 4, 32>}, {transform_indices = @transform_3, window_bounds = array<i64: 8, 32>}, {transform_indices = @transform_4, window_bounds = array<i64: 1, 8, 32>}]} {
    %c0 = arith.constant 0 : index
    %c0_0 = arith.constant 0 : index
    %c0_1 = arith.constant 0 : index
    %0 = vector.load %arg2[%c0, %c0_0, %c0_1] : memref<1x8x4xf32, #tpu.memory_space<vmem>>, vector<1x8x4xf32>
    %1 = vector.shape_cast %0 : vector<1x8x4xf32> to vector<8x4xf32>
    %c0_2 = arith.constant 0 : index
    %c0_3 = arith.constant 0 : index
    %c0_4 = arith.constant 0 : index
    %c0_5 = arith.constant 0 : index
    %2 = vector.load %arg3[%c0_2, %c0_3, %c0_4, %c0_5] : memref<1x1x2x4xf32, #tpu.memory_space<vmem>>, vector<1x1x2x4xf32>
    %3 = vector.shape_cast %2 : vector<1x1x2x4xf32> to vector<2x4xf32>
    %4 = tpu.iota {dimensions = array<i32: 0>} : vector<8x1xi32>
    %c0_i32 = arith.constant 0 : i32
    %5 = vector.broadcast %c0_i32 : i32 to vector<8x1xi32>
    %6 = arith.cmpi eq, %4, %5 : vector<8x1xi32>
    %7 = vector.extract_strided_slice %3 {offsets = [0, 0], sizes = [1, 4], strides = [1, 1]} : vector<2x4xf32> to vector<1x4xf32>
    %c1_i32 = arith.constant 1 : i32
    %8 = tpu.dynamic_rotate %1 by %c1_i32 dim 0 : vector<8x4xf32>, i32 -> vector<8x4xf32>
    %9 = vector.shape_cast %6 : vector<8x1xi1> to vector<8x1xi1>
    %10 = vector.broadcast %9 : vector<8x1xi1> to vector<8x4xi1>
    %11 = vector.shape_cast %7 : vector<1x4xf32> to vector<1x4xf32>
    %12 = vector.broadcast %11 : vector<1x4xf32> to vector<8x4xf32>
    %13 = arith.select %10, %12, %8 : vector<8x4xi1>, vector<8x4xf32>
    %c7_i32 = arith.constant 7 : i32
    %14 = vector.broadcast %c7_i32 : i32 to vector<8x1xi32>
    %15 = arith.cmpi eq, %4, %14 : vector<8x1xi32>
    %16 = vector.extract_strided_slice %3 {offsets = [1, 0], sizes = [1, 4], strides = [1, 1]} : vector<2x4xf32> to vector<1x4xf32>
    %c7_i32_6 = arith.constant 7 : i32
    %17 = tpu.dynamic_rotate %1 by %c7_i32_6 dim 0 : vector<8x4xf32>, i32 -> vector<8x4xf32>
    %18 = vector.shape_cast %15 : vector<8x1xi1> to vector<8x1xi1>
    %19 = vector.broadcast %18 : vector<8x1xi1> to vector<8x4xi1>
    %20 = vector.shape_cast %16 : vector<1x4xf32> to vector<1x4xf32>
    %21 = vector.broadcast %20 : vector<1x4xf32> to vector<8x4xf32>
    %22 = arith.select %19, %21, %17 : vector<8x4xi1>, vector<8x4xf32>
    %c0_7 = arith.constant 0 : index
    %c0_8 = arith.constant 0 : index
    %c0_9 = arith.constant 0 : index
    %23 = vector.load %arg4[%c0_7, %c0_8, %c0_9] : memref<3x4x32xf32, #tpu.memory_space<vmem>>, vector<1x4x32xf32>
    %24 = vector.shape_cast %23 : vector<1x4x32xf32> to vector<4x32xf32>
    %cst = arith.constant dense<0.000000e+00> : vector<8x32xf32>
    %25 = tpu.matmul %13, %24, %cst {dimension_numbers = #tpu.dot_dimension_numbers<[1], [0], [0], [1], [0, 0, 1, 1], [], []>} : vector<8x4xf32>, vector<4x32xf32>, vector<8x32xf32> -> vector<8x32xf32>
    %c1 = arith.constant 1 : index
    %c0_10 = arith.constant 0 : index
    %c0_11 = arith.constant 0 : index
    %26 = vector.load %arg4[%c1, %c0_10, %c0_11] : memref<3x4x32xf32, #tpu.memory_space<vmem>>, vector<1x4x32xf32>
    %27 = vector.shape_cast %26 : vector<1x4x32xf32> to vector<4x32xf32>
    %cst_12 = arith.constant dense<0.000000e+00> : vector<8x32xf32>
    %28 = tpu.matmul %1, %27, %cst_12 {dimension_numbers = #tpu.dot_dimension_numbers<[1], [0], [0], [1], [0, 0, 1, 1], [], []>} : vector<8x4xf32>, vector<4x32xf32>, vector<8x32xf32> -> vector<8x32xf32>
    %29 = arith.addf %25, %28 : vector<8x32xf32>
    %c2 = arith.constant 2 : index
    %c0_13 = arith.constant 0 : index
    %c0_14 = arith.constant 0 : index
    %30 = vector.load %arg4[%c2, %c0_13, %c0_14] : memref<3x4x32xf32, #tpu.memory_space<vmem>>, vector<1x4x32xf32>
    %31 = vector.shape_cast %30 : vector<1x4x32xf32> to vector<4x32xf32>
    %cst_15 = arith.constant dense<0.000000e+00> : vector<8x32xf32>
    %32 = tpu.matmul %22, %31, %cst_15 {dimension_numbers = #tpu.dot_dimension_numbers<[1], [0], [0], [1], [0, 0, 1, 1], [], []>} : vector<8x4xf32>, vector<4x32xf32>, vector<8x32xf32> -> vector<8x32xf32>
    %33 = arith.addf %29, %32 : vector<8x32xf32>
    %c0_16 = arith.constant 0 : index
    %c0_17 = arith.constant 0 : index
    %34 = vector.load %arg5[%c0_16, %c0_17] : memref<8x32xf32, #tpu.memory_space<vmem>>, vector<8x32xf32>
    %35 = arith.addf %33, %34 : vector<8x32xf32>
    %c0_18 = arith.constant 0 : index
    %c0_19 = arith.constant 0 : index
    %c0_20 = arith.constant 0 : index
    %36 = vector.load %arg6[%c0_18, %c0_19, %c0_20] : memref<1x8x32xf32, #tpu.memory_space<vmem>>, vector<1x8x32xf32>
    %37 = vector.shape_cast %36 : vector<1x8x32xf32> to vector<8x32xf32>
    %38 = vector.shape_cast %35 : vector<8x32xf32> to vector<1x8x32xf32>
    tpu.vector_store %arg6[%c0_18, %c0_19, %c0_20], %38 {strides = array<i32>} : memref<1x8x32xf32, #tpu.memory_space<vmem>>, vector<1x8x32xf32>,
    return
  }
  func.func @transform_0(%arg0: i32, %arg1: i32) -> (i32, i32, i32) {
    %c0_i32 = arith.constant 0 : i32
    %c0_i32_0 = arith.constant 0 : i32
    return %arg1, %arg0, %c0_i32 : i32, i32, i32
  }
  func.func @transform_1(%arg0: i32, %arg1: i32) -> (i32, i32, i32, i32) {
    %c0_i32 = arith.constant 0 : i32
    %c0_i32_0 = arith.constant 0 : i32
    %c0_i32_1 = arith.constant 0 : i32
    return %arg1, %arg0, %c0_i32, %c0_i32_0 : i32, i32, i32, i32
  }
  func.func @transform_2(%arg0: i32, %arg1: i32) -> (i32, i32, i32) {
    %c0_i32 = arith.constant 0 : i32
    %c0_i32_0 = arith.constant 0 : i32
    %c0_i32_1 = arith.constant 0 : i32
    %c0_i32_2 = arith.constant 0 : i32
    return %c0_i32, %c0_i32_0, %c0_i32_1 : i32, i32, i32
  }
  func.func @transform_3(%arg0: i32, %arg1: i32) -> (i32, i32) {
    %c0_i32 = arith.constant 0 : i32
    %c0_i32_0 = arith.constant 0 : i32
    return %arg0, %c0_i32 : i32, i32
  }
  func.func @transform_4(%arg0: i32, %arg1: i32) -> (i32, i32, i32) {
    %c0_i32 = arith.constant 0 : i32
    %c0_i32_0 = arith.constant 0 : i32
    return %arg1, %arg0, %c0_i32 : i32, i32, i32
  }
}

</mosaic_0001>

<bundles_post_ra>
// kernel: tpu_custom_call.1
= control target key start
LH: loop header
LB: loop body
LE: loop exit
PB: predicated region body
PF: predicated region fallthrough
CT: control target
= control target key end

     0   :  { %9 = vsyncpa [#allocation3], 0  ;;  %s780_s0 = inlined_call_operand.vmem [shape: f32[2,8,4], index: 0, kind: input, shape index: {}]   ;;  %s781_s1 = inlined_call_operand.vmem [shape: f32[2,1,2,4], index: 1, kind: input, shape index: {}]   ;;  %s782_s2 = inlined_call_operand.vmem [shape: f32[3,4,32], index: 2, kind: input, shape index: {}]   ;;  %s783_s3 = inlined_call_operand.vmem [shape: f32[8,32], index: 3, kind: input, shape index: {}]   ;;  %s784_s4 = inlined_call_operand.hbm [shape: f32[2,8,32], index: 4, kind: output, shape index: {}]  }
   0x1   :  { %11 = vsyncpa [#allocation3 + $0x1], 0  ;;  %s668_s15 = smov 0   ;;  %s670_s16 = smov 0  }
   0x2   :  { %s672_s17 = smov 0   ;;  %s674_s18 = smov 0  }
   0x3   :  { %s676_s19 = smov 0   ;;  %s678_s20 = smov 0  }
   0x4 LB: > { %s487_s21 = sadd.s32 4294967295, %s641_s20   ;;  %s488_s22 = sadd.s32 4294967294, %s641_s20   ;;  %s641_s20 = sphi %s678_s20, %s17_s20   ;;  %s637_s19 = sphi %s676_s19, %s791_s19   ;;  %s633_s18 = sphi %s674_s18, %s790_s18   ;;  %s629_s17 = sphi %s672_s17, %s789_s17   ;;  %s625_s16 = sphi %s670_s16, %s788_s16   ;;  %s621_s15 = sphi %s668_s15, %s787_s15  }
   0x5   : > { %s26_s23 = sadd.s32 1, %s637_s19  ;;  %s141_s24 = sadd.s32 1, %s629_s17 }
   0x6   : > { %p27_p0 = scmp.ge.s32.totalorder %s26_s23, 2  ;;  %p151_p1 = scmp.ne.s32.totalorder %s629_s17, %s625_s16 }
   0x7   : > { %p152_p2 = scmp.eq.s32.totalorder %s487_s21, 1  ;;  %p157_p3 = scmp.ne.s32.totalorder %s625_s16, %s621_s15 }
   0x8   : > { %s793_s23 = smov (%p27_p0, %s26_s23), 0  ;;  %p158_p5 = scmp.eq.s32.totalorder %s488_s22, 1 }
   0x9   : > { %p708_p4 = por %p152_p2, %p151_p1  ;;  %s136_s26 = ssub.s32 %s637_s19, %s793_s23 }
   0xa   : > { %p492_p6 = scmp.ge.s32.totalorder %s641_s20, 1  ;;  %p139_p7 = scmp.eq.s32.totalorder %s136_s26, 0 }
   0xb   : > { %p715_p8 = por %p158_p5, %p157_p3  ;;  %p206_p9 = scmp.lt.s32.totalorder %s641_s20, 3 }
   0xc   : > { %s721_s28 = scalar_select %p139_p7, %s629_s17, %s141_s24  }
   0xd   : > { %p207_p10 = pnand %p492_p6, %p206_p9 }
   0xe   : > { %p245_p11 = scmp.lt.s32.totalorder (!%p207_p10), %s633_s18, 1  ;;  %s242_s26 = sand.u32 (!%p207_p10), 1, %s625_s16  }
   0xf   : > { %210 = sbr.rel (%p207_p10) target bundleno = 168 (0xa8), region = 36  ;;  %s493_s29 = sshll.u32 (!%p207_p10), %s242_s26, 3 }
  0x10   : > { %s505_s30 = sshll.u32 (!%p207_p10), %s633_s18, 3 }
  0x11   : > { %s381_s7 = scalar_lea.hbm (!%p207_p10), %s784_s4, %s505_s30 }
  0x12   : > { %s385_s12 = sshll.u32 (!%p207_p10), %s381_s7, 4  ;;  %s386_s12 = int_to_ptr.hbm [resolvable:$true] %s385_s12 }
  0x13   : > { %s577_s13 = sshra.s32 (!%p207_p10), %s386_s12, 4  ;;  %s578_s13 = int_to_ptr.hbm [resolvable:$true] %s577_s13 }
  0x14   : > { %vm286_vm0 = vcmask 1043456   ;;  %v501_v0 = vld [vmem:[%s782_s2 + $0x8] sm:$0xf]  ;;  %v265_v1 = vlaneseq  ;;  %v496_v2 = vld [vmem:[%s782_s2 + $0x4] sm:$0xf]  ;;  %s246_s9 = scalar_select %p245_p11, %s633_s18, 1 }
  0x15   : > { %502 = vmatpush.msk.msra.mxu2 %vm286_vm0, %v501_v0  ;;  %v279_v3 = vld [vmem:[%s782_s2] sm:$0xf]  ;;  %497 = vmatpush.msk.msra.mxu0 %vm286_vm0, %v496_v2  ;;  %vm282_vm2 = vcmask 31744   ;;  %vm367_vm4 = vcmask 261120   ;;  %s370_s18 = scalar_lea.sflag [#allocation3], %s242_s26  ;;  %p584_p1 = scmp.lt.s32.totalorder %s578_s13, %s784_s4 }
  0x16   : > { %v266_v4 = vshrl.u32 %v265_v1, 7  ;;  %499 = vmatpush.msk.msra.mxu1 %vm286_vm0, %v279_v3  ;;  %s494_s10 = sshll.u32 %s246_s9, 3  ;;  %s495_s11 = sshll.u32 %s246_s9, 1  ;;  %v365_v17 = vld [vmem:[%s783_s3] sm:$0xff] }
  0x17   : > { %s251_s14 = scalar_lea.vmem %s780_s0, %s494_s10  ;;  %s258_s24 = scalar_lea.vmem %s781_s1, %s495_s11 }
  0x18   : > { %v263_v5 = vld [vmem:[%s251_s14] sm:$0xff]  ;;  %vm273_vm1 = vcmp.eq.s32.totalorder %v266_v4, 7  ;;  %vm267_vm3 = vcmp.eq.s32.totalorder %v266_v4, 0  ;;  %s244_s10 = scalar_lea.vmem [#allocation2], %s493_s29  ;;  %s579_s14 = scalar_lea.hbm %s578_s13, 8 }
  0x19   : > { %v264_v6 = vld [vmem:[%s258_s24] sm:$0x3]  ;;  %v274_v7 = vrot.slane %v263_v5, 1  ;;  %498 = vmatmul.msk.f32.vlgmr.msra.gmra.mxu0 %vm282_vm2, %v263_v5  ;;  %v268_v9 = vrot.slane %v263_v5, 7  ;;  %s383_s11 = sshll.u32 %s244_s10, 4  ;;  %p580_p12 = scmp.ne.s32.totalorder %s578_s13, %s579_s14  ;;  %s384_s11 = int_to_ptr.vmem [resolvable:$true] %s383_s11 }
  0x1a   : > { %v277_v8 = vperm.slane %v264_v6, 1  ;;  %v271_v10 = vperm.slane %v264_v6, 0  ;;  %s583_s24 = scalar_lea.hbm %s784_s4, 16 }
  0x1b   : > { %p581_p13 = pnand %p580_p12, %p708_p4  ;;  %p585_p2 = scmp.lt.s32.totalorder %s583_s24, %s579_s14 }
  0x1c   : > { %v278_v11 = vsel %vm273_vm1, %v277_v8, %v274_v7  ;;  %v272_v12 = vsel %vm267_vm3, %v271_v10, %v268_v9 }
  0x1d   : > { %503 = vmatmul.msk.f32.vlgmr.msra.gmra.mxu2 %vm282_vm2, %v278_v11  ;;  %500 = vmatmul.msk.f32.vlgmr.msra.gmra.mxu1 %vm282_vm2, %v272_v12  ;;  %p582_p0 = pneg %p581_p13  ;;  %p586_p3 = por %p585_p2, %p584_p1 }
  0x1f   : > { %p587_p5 = pnand %p586_p3, %p582_p0 }
  0x96   : > { %v307_v13 = vpop.f32.mrf.mxu0 }
  0x9a   : > { %v333_v14 = vpop.f32.mrf.mxu1 }
  0x9b   : > { %v334_v15 = vadd.f32 %v333_v14, %v307_v13 }
  0xa0   : > { %v361_v16 = vpop.f32.mrf.mxu2 }
  0xa1   : > { %v364_v18 = vadd.f32 %v361_v16, %v334_v15 }
  0xa3   : > { %v366_v19 = vadd.f32 %v365_v17, %v364_v18 }
  0xa5   : > { %368 = vst.msk [vmem:[%s244_s10] sm:$0xff] %vm367_vm4, %v366_v19 }
  0xa6   : > { %590 = shalt.err (!%p587_p5)
}
  0xa7   : > { %508 = dma.vmem_to_hbm [thread:$0]  (%p708_p4), %s384_s11, 128, %s386_s12, %s370_s18  }
  0xa8 PF: > { %p514_p6 = scmp.ge.s32.totalorder %s641_s20, 2  ;;  %s397_s26 = sand.u32 1, %s621_s15  }
  0xa9   : > { %s398_s5 = scalar_lea.sflag [#allocation3], %s397_s26 }
  0xaa   : > { %p511_p7 = pnand %p514_p6, %p715_p8 }
  0xac   : > { %p512_p9 = pneg %p511_p7 }
  0xae   : > { %616 = dma.done.wait (%p512_p9), %s398_s5, 128  }
  0xaf   : > { %618 = vsyncadd (%p512_p9), %s398_s5, 4294967168  ;;  %s17_s20 = sadd.s32 1, %s641_s20   ;;  %s787_s15 = smov %s625_s16 }
  0xb0   : > { %p14_p10 = scmp.ge.s32.totalorder %s17_s20, 4   ;;  %s788_s16 = smov %s629_s17 }
  0xb1   : > { %s789_s17 = smov %s721_s28  ;;  %s790_s18 = smov %s637_s19 }
  0xb2   : > { %s791_s19 = smov %s793_s23  ;;  %16 = sbr.rel (!%p14_p10) target bundleno = 4 (0x4), region = 79 }
  0xb7   :  { %404 = vsyncpa [#allocation3], 1 }
  0xb8   :  { %406 = vsyncpa [#allocation3 + $0x1], 1 }

</bundles_post_ra>
